<compile_context>
chip_gen: v7x
topology: tpu7x:2x2x1
jax: 0.10.0
libtpu: 0.0.40
codegen_flags: <defaults>
</compile_context>

<pallas_src>
import math

import jax
import jax.numpy as jnp
from jax.experimental import pallas as pl
from jax.experimental.pallas import tpu as pltpu

# Chunking policy for the HBM->HBM DMA: aim for ~4 MiB per descriptor, with at
# most 8 outstanding copies.  Small tables are moved by a single DMA.
_CHUNK_TARGET_BYTES = 4 * 1024 * 1024
_MAX_OUTSTANDING = 8


def _compute_chunks(num_rows, row_bytes):
    """Static (start_row, n_rows) chunks covering [0, num_rows)."""
    total_bytes = num_rows * row_bytes
    if num_rows <= 1 or total_bytes <= _CHUNK_TARGET_BYTES:
        return ((0, num_rows),)
    n_chunks = min(_MAX_OUTSTANDING,
                   pl.cdiv(total_bytes, _CHUNK_TARGET_BYTES),
                   num_rows)
    base = num_rows // n_chunks
    rem = num_rows % n_chunks
    chunks = []
    start = 0
    for i in range(n_chunks):
        size = base + (1 if i < rem else 0)
        chunks.append((start, size))
        start += size
    return tuple(chunks)


def _make_hbm_copy_kernel(chunks):
    """Kernel: issue chunked HBM->HBM DMAs, then wait on all of them."""

    def kernel(src_hbm, dst_hbm, sems):
        # Start all outstanding copies (row-slices are static Python ints).
        for idx, (start, size) in enumerate(chunks):
            pltpu.make_async_copy(
                src_hbm.at[start:start + size],
                dst_hbm.at[start:start + size],
                sems.at[idx],
            ).start()
        # Wait on all of them (identical descriptors -> same sem / size).
        for idx, (start, size) in enumerate(chunks):
            pltpu.make_async_copy(
                src_hbm.at[start:start + size],
                dst_hbm.at[start:start + size],
                sems.at[idx],
            ).wait()

    return kernel


def _materialize_copy(table):
    """Explicit materializing copy of `table` via direct HBM->HBM DMA."""
    num_rows = table.shape[0]
    row_elems = math.prod(table.shape[1:]) if table.ndim > 1 else 1
    itemsize = jnp.dtype(table.dtype).itemsize
    row_bytes = row_elems * itemsize
    total_bytes = num_rows * row_bytes

    chunks = _compute_chunks(num_rows, row_bytes)
    kernel = _make_hbm_copy_kernel(chunks)

    return pl.pallas_call(
        kernel,
        out_shape=jax.ShapeDtypeStruct(table.shape, table.dtype),
        in_specs=[pl.BlockSpec(memory_space=pl.ANY)],
        out_specs=pl.BlockSpec(memory_space=pl.ANY),
        scratch_shapes=[pltpu.SemaphoreType.DMA((len(chunks),))],
        compiler_params=pltpu.CompilerParams(has_side_effects=True),
        cost_estimate=pl.CostEstimate(
            flops=0, transcendentals=0, bytes_accessed=2 * total_bytes),
    )(table)


def gcnet_forward(embedding_weight, x, edge_index, *, materialize=False):
    """Reproduces GCNet.forward: returns `self.init.weight`.

    `x` and `edge_index` mirror `data.x` / `data.edge_index` but are unused,
    exactly as in the reference (early `return x`).  Default is a zero-copy
    return; pass materialize=True to force an explicit Pallas HBM->HBM copy.
    """
    del x, edge_index  # unused due to the early return in the reference
    if not materialize:
        # Fastest correct implementation: the forward is an identity.
        return jnp.asarray(embedding_weight)
    return _materialize_copy(embedding_weight)


class GCNetParams:
    """Parameters for the live forward path (just the embedding table).

    GATConv / BatchNorm1d / Linear parameters from __init__ are dead code
    (unreachable after the early return) and intentionally not constructed.
    """

    def __init__(self, num_nodes, num_feature, key):
        # nn.Embedding default init: N(0, 1)
        self.init_weight = jax.random.normal(
            key, (num_nodes, num_feature), dtype=jnp.float32)


if __name__ == "__main__":
    num_nodes = 16
    num_feature = 32

    key = jax.random.PRNGKey(0)
    k_emb, kx, ke, k_big = jax.random.split(key, 4)
    params = GCNetParams(num_nodes, num_feature, k_emb)

    # Example graph inputs (unused by the forward, matching the reference).
    x_in = jax.random.normal(kx, (num_nodes, num_feature), dtype=jnp.float32)
    edge_index = jax.random.randint(ke, (2, 40), 0, num_nodes, dtype=jnp.int32)

    # 1) Default (zero-copy) live path.
    out_fast = gcnet_forward(params.init_weight, x_in, edge_index)
    out_fast = jax.block_until_ready(out_fast)
    assert out_fast.shape == (num_nodes, num_feature)
    assert bool(jnp.array_equal(out_fast, params.init_weight))

    # 2) Materializing path: single direct HBM->HBM DMA (small table).
    out_copy = gcnet_forward(params.init_weight, x_in, edge_index,
                             materialize=True)
    out_copy = jax.block_until_ready(out_copy)
    assert out_copy.shape == (num_nodes, num_feature)
    assert bool(jnp.array_equal(out_copy, params.init_weight))

    # 3) Exercise the chunked multi-DMA path with a larger, oddly-shaped table
    #    (row count not a multiple of 8, feature dim not a multiple of 128):
    #    6001 * 320 * 4 B ~= 7.7 MiB -> 2 outstanding DMA chunks.
    big = jax.random.normal(k_big, (6001, 320), dtype=jnp.float32)
    big_copy = jax.block_until_ready(_materialize_copy(big))
    assert big_copy.shape == big.shape
    assert bool(jnp.array_equal(big_copy, big))

    print("KERNEL_OK")
</pallas_src>

<mosaic_0001>
module attributes {stable_mosaic.version = 11 : i64} {
  func.func @kernel(%arg0: memref<16x32xf32, #tpu.memory_space<any>>, %arg1: memref<16x32xf32, #tpu.memory_space<any>>, %arg2: memref<1x!tpu.dma_semaphore, #tpu.memory_space<semaphore_mem>>) attributes {dimension_semantics = [], scalar_prefetch = 0 : i64, scratch_operands = 1 : i64, tpu.core_type = #tpu.core_type<tc>} {
    %c0_i32 = arith.constant 0 : i32
    %c0_i32_0 = arith.constant 0 : i32
    %c0_i32_1 = arith.constant 0 : i32
    %0 = tpu.memref_slice %arg0[%c0_i32_0, %c0_i32_1] : memref<16x32xf32, #tpu.memory_space<any>> -> memref<16x32xf32, #tpu.memory_space<any>>
    %c0_i32_2 = arith.constant 0 : i32
    %c0_i32_3 = arith.constant 0 : i32
    %1 = tpu.memref_slice %arg1[%c0_i32_2, %c0_i32_3] : memref<16x32xf32, #tpu.memory_space<any>> -> memref<16x32xf32, #tpu.memory_space<any>>
    %2 = tpu.memref_slice %arg2[%c0_i32] : memref<1x!tpu.dma_semaphore, #tpu.memory_space<semaphore_mem>> -> memref<1x!tpu.dma_semaphore, #tpu.memory_space<semaphore_mem>>
    %3 = tpu.memref_squeeze %2 : memref<1x!tpu.dma_semaphore, #tpu.memory_space<semaphore_mem>> -> memref<!tpu.dma_semaphore, #tpu.memory_space<semaphore_mem>>
    tpu.enqueue_dma source(%0 : memref<16x32xf32, #tpu.memory_space<any>>) target(%1 : memref<16x32xf32, #tpu.memory_space<any>>) target_semaphore(%3 : memref<!tpu.dma_semaphore, #tpu.memory_space<semaphore_mem>>)
    %c0_i32_4 = arith.constant 0 : i32
    %c0_i32_5 = arith.constant 0 : i32
    %c0_i32_6 = arith.constant 0 : i32
    %4 = tpu.memref_slice %arg0[%c0_i32_5, %c0_i32_6] : memref<16x32xf32, #tpu.memory_space<any>> -> memref<16x32xf32, #tpu.memory_space<any>>
    %c0_i32_7 = arith.constant 0 : i32
    %c0_i32_8 = arith.constant 0 : i32
    %5 = tpu.memref_slice %arg1[%c0_i32_7, %c0_i32_8] : memref<16x32xf32, #tpu.memory_space<any>> -> memref<16x32xf32, #tpu.memory_space<any>>
    %6 = tpu.memref_slice %arg2[%c0_i32_4] : memref<1x!tpu.dma_semaphore, #tpu.memory_space<semaphore_mem>> -> memref<1x!tpu.dma_semaphore, #tpu.memory_space<semaphore_mem>>
    %7 = tpu.memref_squeeze %6 : memref<1x!tpu.dma_semaphore, #tpu.memory_space<semaphore_mem>> -> memref<!tpu.dma_semaphore, #tpu.memory_space<semaphore_mem>>
    tpu.wait_dma2 semaphore(%7 : memref<!tpu.dma_semaphore, #tpu.memory_space<semaphore_mem>>) src(%4 : memref<16x32xf32, #tpu.memory_space<any>>) dst(%5 : memref<16x32xf32, #tpu.memory_space<any>>)
    return
  }
}

</mosaic_0001>

<bundles_post_ra>
// kernel: tpu_custom_call.1
= control target key start
LH: loop header
LB: loop body
LE: loop exit
PB: predicated region body
PF: predicated region fallthrough
CT: control target
= control target key end

     0   :  { %s34_s6 = smov [#allocation2]   ;;  %s35_s7 = smov [#allocation3]   ;;  %s53_s0 = inlined_call_operand.hbm [shape: f32[16,32], index: 0, kind: input, shape index: {}]   ;;  %s54_s1 = inlined_call_operand.hbm [shape: f32[16,32], index: 1, kind: output, shape index: {}]  }
   0x1   :  { %s36_s8 = smov 0  }
   0x2   :  { %18 = dma.general %s53_s0, 256, %s54_s1, %s34_s6, %s35_s7, [#allocation4], %s36_s8, 0  }
   0x3   :  { %32 = dma.done.wait [#allocation2], 256 }
   0x4   :  { %33 = vsyncadd [#allocation2], 4294967040 }
   0x5   :  { %22 = vsyncmov [#allocation2] }
   0x8   :  { %s23_s13 = vpop.sfrf %22 }
   0x9   :  { %p28_p0 = scmp.ne.s32.totalorder %s23_s13, 0 }
   0xb   :  { %27 = shalt.err (%p28_p0)  }

</bundles_post_ra>
